<compile_context>
chip_gen: v6e
topology: v6e:2x2x1
jax: 0.10.0
libtpu: 0.0.40
codegen_flags: <defaults>
</compile_context>

<pallas_src>
import functools

import jax
import jax.numpy as jnp
from jax.experimental import pallas as pl
from jax.experimental.pallas import tpu as pltpu

D = 32            # feature_dim
PACK = 4          # original rows packed along the 128-lane axis
LANES = D * PACK  # 128


def _round_up(x, m):
    return -(-x // m) * m


def _cdiv(a, b):
    return -(-a // b)


def _autoencoder_kernel(x_ref, w_ref, b_ref, o_ref):
    """Fused encoder -> quantize -> decoder for one (tm, 128) tile of lane-packed rows.

    x_ref: (tm, 128) f32 input tile (4 original 32-feature rows per packed row)
    w_ref: (4, 128, 128) block-diagonal weights [We1, We2, Wd1/div, Wd2] (bf16 fast / f32 exact)
    b_ref: (4, 1, 128)   lane-tiled biases      [be1, be2, bd1,     bd2] (f32)
    """
    cdt = w_ref.dtype  # matmul operand dtype; accumulation is always f32

    x = x_ref[...].astype(cdt)

    # ---- Encoder ----
    h1 = jnp.dot(x, w_ref[0], preferred_element_type=jnp.float32) + b_ref[0]
    h1 = jnp.maximum(h1, 0.0)                                   # ReLU (f32)
    latent = jnp.dot(h1.astype(cdt), w_ref[1],
                     preferred_element_type=jnp.float32) + b_ref[1]

    # ---- StraightThrough quantization (round-half-to-even, same as torch.round) ----
    q = jnp.round(latent)                                       # f32

    # ---- Decoder (div already folded into w_ref[2]; exact because div == ones) ----
    h2 = jnp.dot(q.astype(cdt), w_ref[2],
                 preferred_element_type=jnp.float32) + b_ref[2]
    h2 = jnp.maximum(h2, 0.0)                                   # ReLU (f32)
    out = jnp.dot(h2.astype(cdt), w_ref[3],
                  preferred_element_type=jnp.float32) + b_ref[3]

    o_ref[...] = out.astype(o_ref.dtype)


@functools.partial(jax.jit, static_argnames=("tm", "use_bf16"))
def latent_autoencoder_forward(x, params, *, tm=2048, use_bf16=True):
    """x: (N, 32) float32.  params: dict of weights (see init_params).

    tm is the max row tile in *packed* rows (each packed row = 4 original rows).
    use_bf16=True casts the matmul operands to bf16 (f32 accumulation); False is the
    exact-f32 path matching the PyTorch module bit-for-bit up to matmul rounding.
    """
    N, d = x.shape
    assert d == D, "feature_dim must be 32 for this packing"

    compute_dtype = jnp.bfloat16 if use_bf16 else jnp.float32

    # ---- host-side weight prep (tiny; traced once per jit) ----
    # Fold div into the decoder's first layer: z @ Wd1 == q @ (diag(1/div) @ Wd1).
    # Exact here because div == ones (latent_norm='none').
    wd1_eff = params["wd1"] / params["div"].reshape(d, 1)

    eye = jnp.eye(PACK, dtype=jnp.float32)

    def block_diag(w):           # (d, d) -> (128, 128): 4 copies on the diagonal
        return jnp.kron(eye, w.astype(jnp.float32))

    def tile_bias(b):            # (1, d) -> (1, 128)
        return jnp.tile(b.astype(jnp.float32), (1, PACK))

    W = jnp.stack([block_diag(params["we1"]), block_diag(params["we2"]),
                   block_diag(wd1_eff),       block_diag(params["wd2"])]
                  ).astype(compute_dtype)
    B = jnp.stack([tile_bias(params["be1"]), tile_bias(params["be2"]),
                   tile_bias(params["bd1"]), tile_bias(params["bd2"])])

    # ---- lane-pack rows: (N, 32) -> (ceil(N/4), 128); pads at most 3 rows ----
    n_grp = _cdiv(N, PACK)
    pad_rows = n_grp * PACK - N
    xp = jnp.pad(x, ((0, pad_rows), (0, 0))) if pad_rows else x
    xp = xp.reshape(n_grp, LANES)

    # ---- row-tile selection: aim for >= ~8 grid steps (v7x dual-TC + pipeline depth),
    #      keep tiles >= 256 packed rows when possible, cap at `tm` (VMEM budget). ----
    MIN_GRID_STEPS = 8
    MIN_TILE = 256
    n8 = _round_up(n_grp, 8)
    tm_eff = _round_up(_cdiv(n_grp, MIN_GRID_STEPS), 8)
    tm_eff = max(tm_eff, min(MIN_TILE, n8))
    tm_eff = max(8, min(tm_eff, _round_up(tm, 8), n8))
    grid = _cdiv(n_grp, tm_eff)   # partial last tile is masked by Pallas; no full-array pad

    out_packed = pl.pallas_call(
        _autoencoder_kernel,
        out_shape=jax.ShapeDtypeStruct((n_grp, LANES), jnp.float32),
        grid_spec=pltpu.PrefetchScalarGridSpec(
            num_scalar_prefetch=0,
            grid=(grid,),
            in_specs=[
                pl.BlockSpec((tm_eff, LANES), lambda i: (i, 0)),          # x tile
                pl.BlockSpec((4, LANES, LANES), lambda i: (0, 0, 0)),     # stacked W (const)
                pl.BlockSpec((4, 1, LANES), lambda i: (0, 0, 0)),         # stacked b (const)
            ],
            out_specs=pl.BlockSpec((tm_eff, LANES), lambda i: (i, 0)),
        ),
        compiler_params=pltpu.CompilerParams(
            dimension_semantics=("parallel",),
            vmem_limit_bytes=32 * 1024 * 1024),
    )(xp, W, B)

    # ---- unpack: (n_grp, 128) -> (n_grp*4, 32); drop the <=3 packing-pad rows ----
    out = out_packed.reshape(n_grp * PACK, d)
    return out[:N] if pad_rows else out


def init_params(key, feature_dim, ldec_std=1.0):
    """Deterministic init matching LatentEncoder/LatentDecoder.reset_parameters('normal', ldec_std):
       scale ~ Normal(0, ldec_std), shift = 0, div = ones."""
    d = feature_dim
    k = jax.random.split(key, 4)
    zeros_row = jnp.zeros((1, d), jnp.float32)
    return {
        # encoder: DecoderLayer(d, d) -> ReLU -> DecoderLayer(d, d)
        "we1": ldec_std * jax.random.normal(k[0], (d, d), jnp.float32),
        "be1": zeros_row,
        "we2": ldec_std * jax.random.normal(k[1], (d, d), jnp.float32),
        "be2": zeros_row,
        # decoder
        "div": jnp.ones((1, d), jnp.float32),
        "wd1": ldec_std * jax.random.normal(k[2], (d, d), jnp.float32),
        "bd1": zeros_row,
        "wd2": ldec_std * jax.random.normal(k[3], (d, d), jnp.float32),
        "bd2": zeros_row,
    }


def reference_forward(x, p, compute_dtype=jnp.float32, return_latent=False):
    """Pure-JAX reference of the PyTorch forward.  compute_dtype=jnp.float32 gives the exact
    module semantics; jnp.bfloat16 gives a matched-precision reference for the fast path
    (same bf16 operand casts, f32 accumulation)."""
    f32 = jnp.float32
    cast = lambda a: a.astype(compute_dtype)
    h1 = jnp.dot(cast(x), cast(p["we1"]), preferred_element_type=f32) + p["be1"]
    h1 = jnp.maximum(h1, 0.0)
    latent = jnp.dot(cast(h1), cast(p["we2"]), preferred_element_type=f32) + p["be2"]
    q = jnp.round(latent)
    z = q / p["div"]
    h2 = jnp.maximum(jnp.dot(cast(z), cast(p["wd1"]), preferred_element_type=f32) + p["bd1"], 0.0)
    out = jnp.dot(cast(h2), cast(p["wd2"]), preferred_element_type=f32) + p["bd2"]
    return (out, latent) if return_latent else out


if __name__ == "__main__":
    feature_dim = 32
    N = 250           # deliberately NOT a multiple of 4 or 8: exercises packing pad + masked tail tile

    key = jax.random.PRNGKey(0)
    k_x, k_p = jax.random.split(key)
    x = jax.random.normal(k_x, (N, feature_dim), jnp.float32)
    params = init_params(k_p, feature_dim, ldec_std=1.0)

    # --- exact path (f32 matmuls): must match the PyTorch-semantics reference tightly ---
    out_f32 = jax.block_until_ready(latent_autoencoder_forward(x, params, use_bf16=False))
    ref_f32 = reference_forward(x, params, jnp.float32)
    assert out_f32.shape == (N, feature_dim)
    assert jnp.allclose(out_f32, ref_f32, atol=1e-4, rtol=1e-4), "f32 path mismatch vs reference"

    # --- fast path (bf16 matmul operands, f32 accumulation): compare against a
    #     matched-precision pure-JAX reference.  Rows whose latent sits essentially on a .5
    #     rounding boundary are exempt — a last-ulp accumulation difference there legitimately
    #     flips the quantizer (inherent to any reduced-precision encoder, per review note). ---
    out_bf16 = jax.block_until_ready(latent_autoencoder_forward(x, params, use_bf16=True))
    ref_bf16, lat = reference_forward(x, params, jnp.bfloat16, return_latent=True)
    dist = jnp.abs(lat - jnp.floor(lat) - 0.5)              # distance to the rounding boundary
    stable_rows = jnp.all(dist > 1e-4, axis=1)              # rows whose quantization is robust
    close = jnp.abs(out_bf16 - ref_bf16) <= (1e-3 + 1e-3 * jnp.abs(ref_bf16))
    assert out_bf16.shape == (N, feature_dim)
    assert float(jnp.mean(stable_rows)) > 0.9, "degenerate test data (too many boundary latents)"
    assert bool(jnp.all(close | ~stable_rows[:, None])), "bf16 path mismatch vs matched reference"

    print("KERNEL_OK")
</pallas_src>

<mosaic_0001>
module attributes {stable_mosaic.version = 11 : i64} {
  func.func @_autoencoder_kernel(%arg0: i32, %arg1: memref<64x128xf32, #tpu.memory_space<vmem>>, %arg2: memref<4x128x128xf32, #tpu.memory_space<vmem>>, %arg3: memref<4x1x128xf32, #tpu.memory_space<vmem>>, %arg4: memref<64x128xf32, #tpu.memory_space<vmem>>) attributes {dimension_semantics = [#tpu.dimension_semantics<parallel>], iteration_bounds = array<i64: 1>, scalar_prefetch = 0 : i64, scratch_operands = 0 : i64, tpu.core_type = #tpu.core_type<tc>, window_params = [{transform_indices = @transform_0, window_bounds = array<i64: 64, 128>}, {pipeline_mode = #tpu.pipeline_mode<synchronous>, transform_indices = @transform_1, window_bounds = array<i64: 4, 128, 128>}, {pipeline_mode = #tpu.pipeline_mode<synchronous>, transform_indices = @transform_2, window_bounds = array<i64: 4, 1, 128>}, {transform_indices = @transform_3, window_bounds = array<i64: 64, 128>}]} {
    %c0 = arith.constant 0 : index
    %c0_0 = arith.constant 0 : index
    %0 = vector.load %arg1[%c0, %c0_0] : memref<64x128xf32, #tpu.memory_space<vmem>>, vector<64x128xf32>
    %c0_1 = arith.constant 0 : index
    %c0_2 = arith.constant 0 : index
    %c0_3 = arith.constant 0 : index
    %1 = vector.load %arg2[%c0_1, %c0_2, %c0_3] : memref<4x128x128xf32, #tpu.memory_space<vmem>>, vector<1x128x128xf32>
    %2 = vector.shape_cast %1 : vector<1x128x128xf32> to vector<128x128xf32>
    %cst = arith.constant dense<0.000000e+00> : vector<64x128xf32>
    %3 = tpu.matmul %0, %2, %cst {dimension_numbers = #tpu.dot_dimension_numbers<[1], [0], [0], [1], [0, 0, 1, 1], [], []>} : vector<64x128xf32>, vector<128x128xf32>, vector<64x128xf32> -> vector<64x128xf32>
    %c0_4 = arith.constant 0 : index
    %c0_5 = arith.constant 0 : index
    %c0_6 = arith.constant 0 : index
    %4 = vector.load %arg3[%c0_4, %c0_5, %c0_6] : memref<4x1x128xf32, #tpu.memory_space<vmem>>, vector<1x1x128xf32>
    %5 = vector.shape_cast %4 : vector<1x1x128xf32> to vector<1x128xf32>
    %6 = vector.broadcast %5 : vector<1x128xf32> to vector<64x128xf32>
    %7 = arith.addf %3, %6 : vector<64x128xf32>
    %cst_7 = arith.constant 0.000000e+00 : f32
    %8 = vector.broadcast %cst_7 : f32 to vector<64x128xf32>
    %9 = arith.maximumf %7, %8 : vector<64x128xf32>
    %c1 = arith.constant 1 : index
    %c0_8 = arith.constant 0 : index
    %c0_9 = arith.constant 0 : index
    %10 = vector.load %arg2[%c1, %c0_8, %c0_9] : memref<4x128x128xf32, #tpu.memory_space<vmem>>, vector<1x128x128xf32>
    %11 = vector.shape_cast %10 : vector<1x128x128xf32> to vector<128x128xf32>
    %cst_10 = arith.constant dense<0.000000e+00> : vector<64x128xf32>
    %12 = tpu.matmul %9, %11, %cst_10 {dimension_numbers = #tpu.dot_dimension_numbers<[1], [0], [0], [1], [0, 0, 1, 1], [], []>} : vector<64x128xf32>, vector<128x128xf32>, vector<64x128xf32> -> vector<64x128xf32>
    %c1_11 = arith.constant 1 : index
    %c0_12 = arith.constant 0 : index
    %c0_13 = arith.constant 0 : index
    %13 = vector.load %arg3[%c1_11, %c0_12, %c0_13] : memref<4x1x128xf32, #tpu.memory_space<vmem>>, vector<1x1x128xf32>
    %14 = vector.shape_cast %13 : vector<1x1x128xf32> to vector<1x128xf32>
    %15 = vector.broadcast %14 : vector<1x128xf32> to vector<64x128xf32>
    %16 = arith.addf %12, %15 : vector<64x128xf32>
    %17 = math.roundeven %16 : vector<64x128xf32>
    %c2 = arith.constant 2 : index
    %c0_14 = arith.constant 0 : index
    %c0_15 = arith.constant 0 : index
    %18 = vector.load %arg2[%c2, %c0_14, %c0_15] : memref<4x128x128xf32, #tpu.memory_space<vmem>>, vector<1x128x128xf32>
    %19 = vector.shape_cast %18 : vector<1x128x128xf32> to vector<128x128xf32>
    %cst_16 = arith.constant dense<0.000000e+00> : vector<64x128xf32>
    %20 = tpu.matmul %17, %19, %cst_16 {dimension_numbers = #tpu.dot_dimension_numbers<[1], [0], [0], [1], [0, 0, 1, 1], [], []>} : vector<64x128xf32>, vector<128x128xf32>, vector<64x128xf32> -> vector<64x128xf32>
    %c2_17 = arith.constant 2 : index
    %c0_18 = arith.constant 0 : index
    %c0_19 = arith.constant 0 : index
    %21 = vector.load %arg3[%c2_17, %c0_18, %c0_19] : memref<4x1x128xf32, #tpu.memory_space<vmem>>, vector<1x1x128xf32>
    %22 = vector.shape_cast %21 : vector<1x1x128xf32> to vector<1x128xf32>
    %23 = vector.broadcast %22 : vector<1x128xf32> to vector<64x128xf32>
    %24 = arith.addf %20, %23 : vector<64x128xf32>
    %cst_20 = arith.constant 0.000000e+00 : f32
    %25 = vector.broadcast %cst_20 : f32 to vector<64x128xf32>
    %26 = arith.maximumf %24, %25 : vector<64x128xf32>
    %c3 = arith.constant 3 : index
    %c0_21 = arith.constant 0 : index
    %c0_22 = arith.constant 0 : index
    %27 = vector.load %arg2[%c3, %c0_21, %c0_22] : memref<4x128x128xf32, #tpu.memory_space<vmem>>, vector<1x128x128xf32>
    %28 = vector.shape_cast %27 : vector<1x128x128xf32> to vector<128x128xf32>
    %cst_23 = arith.constant dense<0.000000e+00> : vector<64x128xf32>
    %29 = tpu.matmul %26, %28, %cst_23 {dimension_numbers = #tpu.dot_dimension_numbers<[1], [0], [0], [1], [0, 0, 1, 1], [], []>} : vector<64x128xf32>, vector<128x128xf32>, vector<64x128xf32> -> vector<64x128xf32>
    %c3_24 = arith.constant 3 : index
    %c0_25 = arith.constant 0 : index
    %c0_26 = arith.constant 0 : index
    %30 = vector.load %arg3[%c3_24, %c0_25, %c0_26] : memref<4x1x128xf32, #tpu.memory_space<vmem>>, vector<1x1x128xf32>
    %31 = vector.shape_cast %30 : vector<1x1x128xf32> to vector<1x128xf32>
    %32 = vector.broadcast %31 : vector<1x128xf32> to vector<64x128xf32>
    %33 = arith.addf %29, %32 : vector<64x128xf32>
    %c0_27 = arith.constant 0 : index
    %c0_28 = arith.constant 0 : index
    %34 = vector.load %arg4[%c0_27, %c0_28] : memref<64x128xf32, #tpu.memory_space<vmem>>, vector<64x128xf32>
    tpu.vector_store %arg4[%c0_27, %c0_28], %33 {strides = array<i32>} : memref<64x128xf32, #tpu.memory_space<vmem>>, vector<64x128xf32>,
    return
  }
  func.func @transform_0(%arg0: i32) -> (i32, i32) {
    %c0_i32 = arith.constant 0 : i32
    %c0_i32_0 = arith.constant 0 : i32
    return %arg0, %c0_i32 : i32, i32
  }
  func.func @transform_1(%arg0: i32) -> (i32, i32, i32) {
    %c0_i32 = arith.constant 0 : i32
    %c0_i32_0 = arith.constant 0 : i32
    %c0_i32_1 = arith.constant 0 : i32
    %c0_i32_2 = arith.constant 0 : i32
    return %c0_i32, %c0_i32_0, %c0_i32_1 : i32, i32, i32
  }
  func.func @transform_2(%arg0: i32) -> (i32, i32, i32) {
    %c0_i32 = arith.constant 0 : i32
    %c0_i32_0 = arith.constant 0 : i32
    %c0_i32_1 = arith.constant 0 : i32
    %c0_i32_2 = arith.constant 0 : i32
    return %c0_i32, %c0_i32_0, %c0_i32_1 : i32, i32, i32
  }
  func.func @transform_3(%arg0: i32) -> (i32, i32) {
    %c0_i32 = arith.constant 0 : i32
    %c0_i32_0 = arith.constant 0 : i32
    return %arg0, %c0_i32 : i32, i32
  }
}

</mosaic_0001>

<bundles_post_ra>
// kernel: latent_autoencoder_forward.1
= control target key start
LH: loop header
LB: loop body
LE: loop exit
PB: predicated region body
PF: predicated region fallthrough
CT: control target
= control target key end

     0   :  { %s1257_s1 = inlined_call_operand.vmem [shape: f32[4,128,128], index: 1, kind: input, shape index: {}]   ;;  %s1258_s0 = inlined_call_operand.vmem [shape: f32[63,128], index: 0, kind: input, shape index: {}]   ;;  %s1259_s2 = inlined_call_operand.vmem [shape: f32[4,1,128], index: 2, kind: input, shape index: {}]   ;;  %s1260_s3 = inlined_call_operand.vmem [shape: f32[63,128], index: 3, kind: output, shape index: {}]  }
   0x1   :  { %v37_v0 = vld [vmem:[%s1257_s1 + $0x78] sm:$0xff]  ;;  %v36_v1 = vld [vmem:[%s1257_s1 + $0x70] sm:$0xff]  ;;  %v35_v2 = vld [vmem:[%s1257_s1 + $0x68] sm:$0xff] }
   0x2   :  { %727 = vmatprep.subr.mxu0 %v37_v0  ;;  %v34_v3 = vld [vmem:[%s1257_s1 + $0x60] sm:$0xff]  ;;  %v33_v5 = vld [vmem:[%s1257_s1 + $0x58] sm:$0xff]  ;;  %v32_v6 = vld [vmem:[%s1257_s1 + $0x50] sm:$0xff] }
   0x3   :  { %728 = vmatpush3.msra.mxu0 %v37_v0  ;;  %v14_v4 = vld [vmem:[%s1258_s0] sm:$0xff]  ;;  %v592_v7 = vld [vmem:[%s1257_s1 + $0xf8] sm:$0xff]  ;;  %v591_v8 = vld [vmem:[%s1257_s1 + $0xf0] sm:$0xff] }
   0x4   :  { %729 = vmatprep.subr.mxu0 %v36_v1  ;;  %759 = vmatprep.mubr.f32.mxu0 %v14_v4  ;;  %v31_v9 = vld [vmem:[%s1257_s1 + $0x48] sm:$0xff]  ;;  %v30_v11 = vld [vmem:[%s1257_s1 + $0x40] sm:$0xff]  ;;  %v29_v13 = vld [vmem:[%s1257_s1 + $0x38] sm:$0xff] }
   0x5   :  { %730 = vmatpush3.msra.mxu0 %v36_v1  ;;  %771 = vmatprep.subr.mxu1 %v592_v7  ;;  %v590_v10 = vld [vmem:[%s1257_s1 + $0xe8] sm:$0xff]  ;;  %v589_v12 = vld [vmem:[%s1257_s1 + $0xe0] sm:$0xff]  ;;  %v588_v14 = vld [vmem:[%s1257_s1 + $0xd8] sm:$0xff] }
   0x6   :  { %731 = vmatprep.subr.mxu0 %v35_v2  ;;  %772 = vmatpush3.msra.mxu1 %v592_v7  ;;  %v28_v15 = vld [vmem:[%s1257_s1 + $0x30] sm:$0xff]  ;;  %v27_v17 = vld [vmem:[%s1257_s1 + $0x28] sm:$0xff]  ;;  %v26_v19 = vld [vmem:[%s1257_s1 + $0x20] sm:$0xff] }
   0x7   :  { %732 = vmatpush3.msra.mxu0 %v35_v2  ;;  %773 = vmatprep.subr.mxu1 %v591_v8  ;;  %v587_v16 = vld [vmem:[%s1257_s1 + $0xd0] sm:$0xff]  ;;  %v586_v18 = vld [vmem:[%s1257_s1 + $0xc8] sm:$0xff]  ;;  %v585_v20 = vld [vmem:[%s1257_s1 + $0xc0] sm:$0xff] }
   0x8   :  { %733 = vmatprep.subr.mxu0 %v34_v3  ;;  %774 = vmatpush3.msra.mxu1 %v591_v8  ;;  %v25_v21 = vld [vmem:[%s1257_s1 + $0x18] sm:$0xff]  ;;  %v24_v23 = vld [vmem:[%s1257_s1 + $0x10] sm:$0xff]  ;;  %v23_v25 = vld [vmem:[%s1257_s1 + $0x8] sm:$0xff] }
   0x9   :  { %734 = vmatpush3.msra.mxu0 %v34_v3  ;;  %775 = vmatprep.subr.mxu1 %v590_v10  ;;  %v584_v22 = vld [vmem:[%s1257_s1 + $0xb8] sm:$0xff]  ;;  %v583_v24 = vld [vmem:[%s1257_s1 + $0xb0] sm:$0xff]  ;;  %v582_v26 = vld [vmem:[%s1257_s1 + $0xa8] sm:$0xff] }
   0xa   :  { %735 = vmatprep.subr.mxu0 %v33_v5  ;;  %776 = vmatpush3.msra.mxu1 %v590_v10  ;;  %v22_v27 = vld [vmem:[%s1257_s1] sm:$0xff]  ;;  %v15_v29 = vld [vmem:[%s1258_s0 + $0x8] sm:$0xff]  ;;  %v16_v30 = vld [vmem:[%s1258_s0 + $0x10] sm:$0xff] }
   0xb   :  { %736 = vmatpush3.msra.mxu0 %v33_v5  ;;  %777 = vmatprep.subr.mxu1 %v589_v12  ;;  %v581_v28 = vld [vmem:[%s1257_s1 + $0xa0] sm:$0xff]  ;;  %v17_v31 = vld [vmem:[%s1258_s0 + $0x18] sm:$0xff]  ;;  %v19_v33 = vld [vmem:[%s1258_s0 + $0x28] sm:$0xff] }
   0xc   :  { %737 = vmatprep.subr.mxu0 %v32_v6  ;;  %778 = vmatpush3.msra.mxu1 %v589_v12  ;;  %v18_v32 = vld [vmem:[%s1258_s0 + $0x20] sm:$0xff]  ;;  %v20_v34 = vld [vmem:[%s1258_s0 + $0x30] sm:$0xff]  ;;  %v21_v35 = vld [vmem:[%s1258_s0 + $0x38] sm:$0xff] }
   0xd   :  { %738 = vmatpush3.msra.mxu0 %v32_v6  ;;  %779 = vmatprep.subr.mxu1 %v588_v14  ;;  %v580_v36 = vld [vmem:[%s1257_s1 + $0x98] sm:$0xff]  ;;  %v579_v37 = vld [vmem:[%s1257_s1 + $0x90] sm:$0xff]  ;;  %v578_v38 = vld [vmem:[%s1257_s1 + $0x88] sm:$0xff] }
   0xe   :  { %739 = vmatprep.subr.mxu0 %v31_v9  ;;  %780 = vmatpush3.msra.mxu1 %v588_v14  ;;  %v577_v39 = vld [vmem:[%s1257_s1 + $0x80] sm:$0xff]  ;;  %v610_v40 = vld [vmem:[%s1257_s1 + $0x178] sm:$0xff]  ;;  %v609_v41 = vld [vmem:[%s1257_s1 + $0x170] sm:$0xff] }
   0xf   :  { %740 = vmatpush3.msra.mxu0 %v31_v9  ;;  %781 = vmatprep.subr.mxu1 %v587_v16  ;;  %v608_v42 = vld [vmem:[%s1257_s1 + $0x168] sm:$0xff]  ;;  %v607_v43 = vld [vmem:[%s1257_s1 + $0x160] sm:$0xff]  ;;  %v606_v44 = vld [vmem:[%s1257_s1 + $0x158] sm:$0xff] }
  0x10   :  { %741 = vmatprep.subr.mxu0 %v30_v11  ;;  %782 = vmatpush3.msra.mxu1 %v587_v16  ;;  %v605_v45 = vld [vmem:[%s1257_s1 + $0x150] sm:$0xff]  ;;  %v604_v46 = vld [vmem:[%s1257_s1 + $0x148] sm:$0xff]  ;;  %v603_v47 = vld [vmem:[%s1257_s1 + $0x140] sm:$0xff] }
  0x11   :  { %742 = vmatpush3.msra.mxu0 %v30_v11  ;;  %783 = vmatprep.subr.mxu1 %v586_v18  ;;  %v602_v48 = vld [vmem:[%s1257_s1 + $0x138] sm:$0xff]  ;;  %v576_v49 = vld [vmem:[%s1259_s2] ss:$0 sm:$0xff]  ;;  %v601_v10 = vld [vmem:[%s1257_s1 + $0x130] sm:$0xff] }
  0x12   :  { %743 = vmatprep.subr.mxu0 %v29_v13  ;;  %784 = vmatpush3.msra.mxu1 %v586_v18  ;;  %v600_v11 = vld [vmem:[%s1257_s1 + $0x128] sm:$0xff]  ;;  %v599_v12 = vld [vmem:[%s1257_s1 + $0x120] sm:$0xff]  ;;  %v597_v14 = vld [vmem:[%s1257_s1 + $0x110] sm:$0xff] }
  0x13   :  { %744 = vmatpush3.msra.mxu0 %v29_v13  ;;  %785 = vmatprep.subr.mxu1 %v585_v20  ;;  %v598_v13 = vld [vmem:[%s1257_s1 + $0x118] sm:$0xff]  ;;  %v595_v16 = vld [vmem:[%s1257_s1 + $0x100] sm:$0xff]  ;;  %v627_v18 = vld [vmem:[%s1257_s1 + $0x1f0] sm:$0xff] }
  0x14   :  { %745 = vmatprep.subr.mxu0 %v28_v15  ;;  %786 = vmatpush3.msra.mxu1 %v585_v20  ;;  %v625_v20 = vld [vmem:[%s1257_s1 + $0x1e0] sm:$0xff] }
  0x15   :  { %746 = vmatpush3.msra.mxu0 %v28_v15  ;;  %787 = vmatprep.subr.mxu1 %v584_v22  ;;  %v596_v15 = vld [vmem:[%s1257_s1 + $0x108] sm:$0xff] }
  0x16   :  { %747 = vmatprep.subr.mxu0 %v27_v17  ;;  %788 = vmatpush3.msra.mxu1 %v584_v22  ;;  %v623_v22 = vld [vmem:[%s1257_s1 + $0x1d0] sm:$0xff] }
  0x17   :  { %748 = vmatpush3.msra.mxu0 %v27_v17  ;;  %789 = vmatprep.subr.mxu1 %v583_v24  ;;  %v628_v17 = vld [vmem:[%s1257_s1 + $0x1f8] sm:$0xff] }
  0x18   :  { %749 = vmatprep.subr.mxu0 %v26_v19  ;;  %790 = vmatpush3.msra.mxu1 %v583_v24  ;;  %v621_v24 = vld [vmem:[%s1257_s1 + $0x1c0] sm:$0xff] }
  0x19   :  { %750 = vmatpush3.msra.mxu0 %v26_v19  ;;  %791 = vmatprep.subr.mxu1 %v582_v26  ;;  %v626_v19 = vld [vmem:[%s1257_s1 + $0x1e8] sm:$0xff] }
  0x1a   :  { %751 = vmatprep.subr.mxu0 %v25_v21  ;;  %792 = vmatpush3.msra.mxu1 %v582_v26  ;;  %v619_v26 = vld [vmem:[%s1257_s1 + $0x1b0] sm:$0xff] }
  0x1b   :  { %752 = vmatpush3.msra.mxu0 %v25_v21  ;;  %793 = vmatprep.subr.mxu1 %v581_v28  ;;  %v624_v21 = vld [vmem:[%s1257_s1 + $0x1d8] sm:$0xff] }
  0x1c   :  { %753 = vmatprep.subr.mxu0 %v24_v23  ;;  %794 = vmatpush3.msra.mxu1 %v581_v28  ;;  %v617_v28 = vld [vmem:[%s1257_s1 + $0x1a0] sm:$0xff] }
  0x1d   :  { %754 = vmatpush3.msra.mxu0 %v24_v23  ;;  %795 = vmatprep.subr.mxu1 %v580_v36  ;;  %v622_v23 = vld [vmem:[%s1257_s1 + $0x1c8] sm:$0xff] }
  0x1e   :  { %755 = vmatprep.subr.mxu0 %v23_v25  ;;  %796 = vmatpush3.msra.mxu1 %v580_v36 }
  0x1f   :  { %756 = vmatpush3.msra.mxu0 %v23_v25  ;;  %797 = vmatprep.subr.mxu1 %v579_v37  ;;  %v620_v25 = vld [vmem:[%s1257_s1 + $0x1b8] sm:$0xff] }
  0x20   :  { %757 = vmatprep.subr.mxu0 %v22_v27  ;;  %798 = vmatpush3.msra.mxu1 %v579_v37 }
  0x21   :  { %758 = vmatpush3.msra.mxu0 %v22_v27  ;;  %799 = vmatprep.subr.mxu1 %v578_v38  ;;  %v618_v27 = vld [vmem:[%s1257_s1 + $0x1a8] sm:$0xff] }
  0x22   :  { %760 = vmatmul.mubr.f32.vlgmr.msra.gmra.mxu0 %v15_v29  ;;  %800 = vmatpush3.msra.mxu1 %v578_v38  ;;  %v594_v29 = vld [vmem:[%s1259_s2 + $0x1] ss:$0 sm:$0xff] }
  0x23   :  { %762 = vmatprep.mubr.f32.mxu0 %v16_v30  ;;  %801 = vmatprep.subr.mxu1 %v577_v39 }
  0x24   :  { %802 = vmatpush3.msra.mxu1 %v577_v39  ;;  %815 = vmatprep.subr.mxu0 %v610_v40 }
  0x25   :  { %816 = vmatpush3.msra.mxu0 %v610_v40  ;;  %859 = vmatprep.subr.mxu1 %v628_v17 }
  0x26   :  { %763 = vmatmul.mubr.f32.gmra.mxu0 %v17_v31  ;;  %817 = vmatprep.subr.mxu0 %v609_v41 }
  0x27   :  { %765 = vmatprep.mubr.f32.mxu0 %v18_v32  ;;  %818 = vmatpush3.msra.mxu0 %v609_v41 }
  0x28   :  { %819 = vmatprep.subr.mxu0 %v608_v42 }
  0x29   :  { %820 = vmatpush3.msra.mxu0 %v608_v42 }
  0x2a   :  { %766 = vmatmul.mubr.f32.gmra.mxu0 %v19_v33  ;;  %821 = vmatprep.subr.mxu0 %v607_v43 }
  0x2b   :  { %768 = vmatprep.mubr.f32.mxu0 %v20_v34  ;;  %822 = vmatpush3.msra.mxu0 %v607_v43 }
  0x2c   :  { %823 = vmatprep.subr.mxu0 %v606_v44 }
  0x2d   :  { %824 = vmatpush3.msra.mxu0 %v606_v44 }
  0x2e   :  { %769 = vmatmul.mubr.f32.gmra.mxu0 %v21_v35  ;;  %825 = vmatprep.subr.mxu0 %v605_v45 }
  0x2f   :  { %826 = vmatpush3.msra.mxu0 %v605_v45 }
  0x30   :  { %827 = vmatprep.subr.mxu0 %v604_v46 }
  0x31   :  { %828 = vmatpush3.msra.mxu0 %v604_v46 }
  0x32   :  { %829 = vmatprep.subr.mxu0 %v603_v47 }
  0x33   :  { %830 = vmatpush3.msra.mxu0 %v603_v47 }
  0x34   :  { %831 = vmatprep.subr.mxu0 %v602_v48 }
  0x35   :  { %832 = vmatpush3.msra.mxu0 %v602_v48 }
  0x36   :  { %833 = vmatprep.subr.mxu0 %v601_v10 }
  0x37   :  { %834 = vmatpush3.msra.mxu0 %v601_v10 }
  0x38   :  { %835 = vmatprep.subr.mxu0 %v600_v11 }
  0x39   :  { %836 = vmatpush3.msra.mxu0 %v600_v11 }
  0x3a   :  { %837 = vmatprep.subr.mxu0 %v599_v12 }
  0x3b   :  { %838 = vmatpush3.msra.mxu0 %v599_v12 }
  0x3c   :  { %839 = vmatprep.subr.mxu0 %v598_v13 }
  0x3d   :  { %840 = vmatpush3.msra.mxu0 %v598_v13 }
  0x3e   :  { %841 = vmatprep.subr.mxu0 %v597_v14 }
  0x3f   :  { %842 = vmatpush3.msra.mxu0 %v597_v14 }
  0x40   :  { %843 = vmatprep.subr.mxu0 %v596_v15 }
  0x41   :  { %844 = vmatpush3.msra.mxu0 %v596_v15 }
  0x42   :  { %845 = vmatprep.subr.mxu0 %v595_v16 }
  0x43   :  { %846 = vmatpush3.msra.mxu0 %v595_v16 }
  0xe2   :  { %v761_v50 = vpop.f32.mrf.mxu0 }
  0xe3   :  { %v117_v51 = vadd.f32 %v761_v50, %v576_v49 }
  0xe4   :  { %v111_v52 = vpop.f32.mrf.mxu0 }
  0xe5   :  { %v112_v53 = vadd.f32 %v576_v49, %v111_v52  ;;  %v151_v56 = vmax.f32 %v117_v51, 0.0 }
  0xe6   :  { %v764_v54 = vpop.f32.mrf.mxu0 }
  0xe7   :  { %v150_v55 = vmax.f32 %v112_v53, 0.0  ;;  %v127_v57 = vadd.f32 %v764_v54, %v576_v49 }
  0xe8   :  { %v121_v58 = vpop.f32.mrf.mxu0 }
  0xe9   :  { %v122_v59 = vadd.f32 %v576_v49, %v121_v58  ;;  %803 = vmatprep.mubr.f32.mxu1 %v150_v55  ;;  %v153_v62 = vmax.f32 %v127_v57, 0.0 }
  0xea   :  { %v767_v60 = vpop.f32.mrf.mxu0  ;;  %804 = vmatmul.mubr.f32.vlgmr.msra.gmra.mxu1 %v151_v56 }
  0xeb   :  { %v152_v61 = vmax.f32 %v122_v59, 0.0  ;;  %v137_v63 = vadd.f32 %v767_v60, %v576_v49  ;;  %860 = vmatpush3.msra.mxu1 %v628_v17 }
  0xec   :  { %v131_v0 = vpop.f32.mrf.mxu0  ;;  %861 = vmatprep.subr.mxu1 %v627_v18 }
  0xed   :  { %v132_v1 = vadd.f32 %v576_v49, %v131_v0  ;;  %806 = vmatprep.mubr.f32.mxu1 %v152_v61  ;;  %v155_v4 = vmax.f32 %v137_v63, 0.0  ;;  %862 = vmatpush3.msra.mxu1 %v627_v18 }
  0xee   :  { %v770_v2 = vpop.f32.mrf.mxu0  ;;  %807 = vmatmul.mubr.f32.gmra.mxu1 %v153_v62  ;;  %863 = vmatprep.subr.mxu1 %v626_v19 }
  0xef   :  { %v154_v3 = vmax.f32 %v132_v1, 0.0  ;;  %v147_v5 = vadd.f32 %v770_v2, %v576_v49  ;;  %864 = vmatpush3.msra.mxu1 %v626_v19 }
  0xf0   :  { %v141_v6 = vpop.f32.mrf.mxu0  ;;  %865 = vmatprep.subr.mxu1 %v625_v20 }
  0xf1   :  { %v142_v7 = vadd.f32 %v576_v49, %v141_v6  ;;  %809 = vmatprep.mubr.f32.mxu1 %v154_v3  ;;  %v157_v9 = vmax.f32 %v147_v5, 0.0  ;;  %866 = vmatpush3.msra.mxu1 %v625_v20 }
  0xf2   :  { %810 = vmatmul.mubr.f32.gmra.mxu1 %v155_v4  ;;  %867 = vmatprep.subr.mxu1 %v624_v21 }
  0xf3   :  { %v156_v8 = vmax.f32 %v142_v7, 0.0  ;;  %868 = vmatpush3.msra.mxu1 %v624_v21 }
  0xf4   :  { %869 = vmatprep.subr.mxu1 %v623_v22 }
  0xf5   :  { %812 = vmatprep.mubr.f32.mxu1 %v156_v8  ;;  %870 = vmatpush3.msra.mxu1 %v623_v22 }
  0xf6   :  { %813 = vmatmul.mubr.f32.gmra.mxu1 %v157_v9  ;;  %871 = vmatprep.subr.mxu1 %v622_v23 }
  0xf7   :  { %872 = vmatpush3.msra.mxu1 %v622_v23 }
  0xf8   :  { %873 = vmatprep.subr.mxu1 %v621_v24 }
  0xf9   :  { %874 = vmatpush3.msra.mxu1 %v621_v24 }
  0xfa   :  { %875 = vmatprep.subr.mxu1 %v620_v25 }
  0xfb   :  { %876 = vmatpush3.msra.mxu1 %v620_v25 }
  0xfc   :  { %877 = vmatprep.subr.mxu1 %v619_v26 }
  0xfd   :  { %878 = vmatpush3.msra.mxu1 %v619_v26 }
  0xfe   :  { %879 = vmatprep.subr.mxu1 %v618_v27 }
  0xff   :  { %880 = vmatpush3.msra.mxu1 %v618_v27 }
 0x100   :  { %881 = vmatprep.subr.mxu1 %v617_v28 }
 0x101   :  { %882 = vmatpush3.msra.mxu1 %v617_v28 }
 0x1aa   :  { %v805_v30 = vpop.f32.mrf.mxu1 }
 0x1ab   :  { %v255_v31 = vadd.f32 %v805_v30, %v594_v29 }
 0x1ac   :  { %v249_v32 = vpop.f32.mrf.mxu1 }
 0x1ad   :  { %v913_v33 = vcvt.f32.s32 %v255_v31  ;;  %v250_v34 = vadd.f32 %v594_v29, %v249_v32  ;;  %v911_v40 = vand.u32 2147483647, %v255_v31  ;;  %v916_v45 = vand.u32 2147483648, %v255_v31 }
 0x1ae   :  { %v808_v35 = vpop.f32.mrf.mxu1 }
 0x1af   :  { %v914_v36 = vcvt.s32.f32 %v913_v33  ;;  %v905_v37 = vcvt.f32.s32 %v250_v34  ;;  %v265_v38 = vadd.f32 %v808_v35, %v594_v29  ;;  %v903_v44 = vand.u32 2147483647, %v250_v34 }
 0x1b0   :  { %v259_v39 = vpop.f32.mrf.mxu1  ;;  %v908_v50 = vand.u32 2147483648, %v250_v34  ;;  %vm1201_vm1 = vcmp.lt.f32.partialorder %v911_v40, 8388608.0 }
 0x1b1   :  { %v915_v41 = vand.u32 2147483647, %v914_v36  ;;  %v929_v42 = vcvt.f32.s32 %v265_v38  ;;  %v260_v43 = vadd.f32 %v594_v29, %v259_v39  ;;  %v906_v47 = vcvt.s32.f32 %v905_v37 }
 0x1b2   :  { %v811_v46 = vpop.f32.mrf.mxu1  ;;  %v927_v54 = vand.u32 2147483647, %v265_v38  ;;  %vm1197_vm0 = vcmp.lt.f32.partialorder %v903_v44, 8388608.0  ;;  %v932_v4 = vand.u32 2147483648, %v265_v38  ;;  %v613_v44 = vld [vmem:[%s1257_s1 + $0x180] sm:$0xff] }
 0x1b3   :  { %v921_v48 = vcvt.f32.s32 %v260_v43  ;;  %v275_v49 = vadd.f32 %v811_v46, %v594_v29  ;;  %v907_v52 = vand.u32 2147483647, %v906_v47  ;;  %v917_v53 = vor.u32 %v916_v45, %v915_v41  ;;  %v616_v41 = vld [vmem:[%s1257_s1 + $0x198] sm:$0xff]  ;;  %v612_v45 = vld [vmem:[%s1259_s2 + $0x2] ss:$0 sm:$0xff] }
 0x1b4   :  { %v269_v51 = vpop.f32.mrf.mxu1  ;;  %v930_v55 = vcvt.s32.f32 %v929_v42  ;;  %v919_v59 = vand.u32 2147483647, %v260_v43  ;;  %v924_v3 = vand.u32 2147483648, %v260_v43  ;;  %vm1209_vm2 = vcmp.lt.f32.partialorder %v927_v54, 8388608.0  ;;  %883 = vmatprep.subr.mxu1 %v616_v41  ;;  %v615_v42 = vld [vmem:[%s1257_s1 + $0x190] sm:$0xff] }
 0x1b5   :  { %v270_v56 = vadd.f32 %v594_v29, %v269_v51  ;;  %v945_v60 = vcvt.f32.s32 %v275_v49  ;;  %v909_v62 = vor.u32 %v908_v50, %v907_v52  ;;  %v922_v63 = vcvt.s32.f32 %v921_v48  ;;  %884 = vmatpush3.msra.mxu1 %v616_v41 }
 0x1b6   :  { %v814_v61 = vpop.f32.mrf.mxu1  ;;  %v931_v0 = vand.u32 2147483647, %v930_v55  ;;  %v918_v7 = vsel %vm1201_vm1, %v917_v53, %v255_v31  ;;  %vm920_vm3 = vcmp.lt.f32.partialorder %v919_v59, 8388608.0  ;;  %v943_v20 = vand.u32 2147483647, %v275_v49  ;;  %885 = vmatprep.subr.mxu1 %v615_v42 }
 0x1b7   :  { %v937_v1 = vcvt.f32.s32 %v270_v56  ;;  %v285_v2 = vadd.f32 %v814_v61, %v594_v29  ;;  %v910_v6 = vsel %vm1197_vm0, %v909_v62, %v250_v34  ;;  %v923_v8 = vand.u32 2147483647, %v922_v63  ;;  %886 = vmatpush3.msra.mxu1 %v615_v42 }
 0x1b8   :  { %v279_v5 = vpop.f32.mrf.mxu1  ;;  %847 = vmatprep.mubr.f32.mxu0 %v910_v6  ;;  %v933_v12 = vor.u32 %v932_v4, %v931_v0  ;;  %v935_v15 = vand.u32 2147483647, %v270_v56  ;;  %v946_v16 = vcvt.s32.f32 %v945_v60  ;;  %v940_v19 = vand.u32 2147483648, %v270_v56  ;;  %v630_v6 = vld [vmem:[%s1259_s2 + $0x3] ss:$0 sm:$0xff] }
 0x1b9   :  { %v961_v10 = vcvt.f32.s32 %v285_v2  ;;  %v280_v11 = vadd.f32 %v594_v29, %v279_v5  ;;  %v938_v13 = vcvt.s32.f32 %v937_v1  ;;  %848 = vmatmul.mubr.f32.vlgmr.msra.gmra.mxu0 %v918_v7  ;;  %v925_v14 = vor.u32 %v924_v3, %v923_v8 }
 0x1ba   :  { %v947_v22 = vand.u32 2147483647, %v946_v16  ;;  %v948_v23 = vand.u32 2147483648, %v275_v49  ;;  %v934_v25 = vsel %vm1209_vm2, %v933_v12, %v265_v38  ;;  %vm936_vm4 = vcmp.lt.f32.partialorder %v935_v15, 8388608.0 }
 0x1bb   :  { %v953_v17 = vcvt.f32.s32 %v280_v11  ;;  %v939_v18 = vand.u32 2147483647, %v938_v13  ;;  %v926_v21 = vsel %vm920_vm3, %v925_v14, %v260_v43  ;;  %v962_v24 = vcvt.s32.f32 %v961_v10  ;;  %v614_v43 = vld [vmem:[%s1257_s1 + $0x188] sm:$0xff] }
 0x1bc   :  { %850 = vmatprep.mubr.f32.mxu0 %v926_v21  ;;  %v949_v28 = vor.u32 %v948_v23, %v947_v22  ;;  %v951_v29 = vand.u32 2147483647, %v280_v11  ;;  %v956_v33 = vand.u32 2147483648, %v280_v11  ;;  %v964_v34 = vand.u32 2147483648, %v285_v2  ;;  %887 = vmatprep.subr.mxu1 %v614_v43 }
 0x1bd   :  { %v941_v26 = vor.u32 %v940_v19, %v939_v18  ;;  %v954_v27 = vcvt.s32.f32 %v953_v17  ;;  %851 = vmatmul.mubr.f32.gmra.mxu0 %v934_v25  ;;  %v963_v30 = vand.u32 2147483647, %v962_v24  ;;  %vm944_vm5 = vcmp.lt.f32.partialorder %v943_v20, 8388608.0  ;;  %888 = vmatpush3.msra.mxu1 %v614_v43 }
 0x1be   :  { %v959_v35 = vand.u32 2147483647, %v285_v2  ;;  %v950_v36 = vsel %vm944_vm5, %v949_v28, %v275_v49  ;;  %vm952_vm6 = vcmp.lt.f32.partialorder %v951_v29, 8388608.0  ;;  %889 = vmatprep.subr.mxu1 %v613_v44 }
 0x1bf   :  { %v942_v31 = vsel %vm936_vm4, %v941_v26, %v270_v56  ;;  %v955_v32 = vand.u32 2147483647, %v954_v27  ;;  %v965_v39 = vor.u32 %v964_v34, %v963_v30  ;;  %890 = vmatpush3.msra.mxu1 %v613_v44 }
 0x1c0   :  { %853 = vmatprep.mubr.f32.mxu0 %v942_v31  ;;  %vm960_vm7 = vcmp.lt.f32.partialorder %v959_v35, 8388608.0 }
 0x1c1   :  { %v957_v37 = vor.u32 %v956_v33, %v955_v32  ;;  %854 = vmatmul.mubr.f32.gmra.mxu0 %v950_v36  ;;  %v966_v40 = vsel %vm960_vm7, %v965_v39, %v285_v2 }
 0x1c3   :  { %v958_v38 = vsel %vm952_vm6, %v957_v37, %v280_v11 }
 0x1c4   :  { %856 = vmatprep.mubr.f32.mxu0 %v958_v38 }
 0x1c5   :  { %857 = vmatmul.mubr.f32.gmra.mxu0 %v966_v40 }
 0x279   :  { %v849_v46 = vpop.f32.mrf.mxu0 }
 0x27a   :  { %v393_v47 = vadd.f32 %v849_v46, %v612_v45 }
 0x27b   :  { %v387_v48 = vpop.f32.mrf.mxu0 }
 0x27c   :  { %v388_v49 = vadd.f32 %v612_v45, %v387_v48  ;;  %v427_v52 = vmax.f32 %v393_v47, 0.0 }
 0x27d   :  { %v852_v50 = vpop.f32.mrf.mxu0 }
 0x27e   :  { %v426_v51 = vmax.f32 %v388_v49, 0.0  ;;  %v403_v53 = vadd.f32 %v852_v50, %v612_v45 }
 0x27f   :  { %v397_v54 = vpop.f32.mrf.mxu0 }
 0x280   :  { %v398_v55 = vadd.f32 %v612_v45, %v397_v54  ;;  %891 = vmatprep.mubr.f32.mxu1 %v426_v51  ;;  %v429_v58 = vmax.f32 %v403_v53, 0.0 }
 0x281   :  { %v855_v56 = vpop.f32.mrf.mxu0  ;;  %892 = vmatmul.mubr.f32.vlgmr.msra.gmra.mxu1 %v427_v52 }
 0x282   :  { %v428_v57 = vmax.f32 %v398_v55, 0.0  ;;  %v413_v59 = vadd.f32 %v855_v56, %v612_v45 }
 0x283   :  { %v407_v60 = vpop.f32.mrf.mxu0 }
 0x284   :  { %v408_v61 = vadd.f32 %v612_v45, %v407_v60  ;;  %894 = vmatprep.mubr.f32.mxu1 %v428_v57  ;;  %v431_v0 = vmax.f32 %v413_v59, 0.0 }
 0x285   :  { %v858_v62 = vpop.f32.mrf.mxu0  ;;  %895 = vmatmul.mubr.f32.gmra.mxu1 %v429_v58 }
 0x286   :  { %v430_v63 = vmax.f32 %v408_v61, 0.0  ;;  %v423_v1 = vadd.f32 %v858_v62, %v612_v45 }
 0x287   :  { %v417_v2 = vpop.f32.mrf.mxu0 }
 0x288   :  { %v418_v3 = vadd.f32 %v612_v45, %v417_v2  ;;  %897 = vmatprep.mubr.f32.mxu1 %v430_v63  ;;  %v433_v5 = vmax.f32 %v423_v1, 0.0 }
 0x289   :  { %898 = vmatmul.mubr.f32.gmra.mxu1 %v431_v0 }
 0x28a   :  { %v432_v4 = vmax.f32 %v418_v3, 0.0 }
 0x28c   :  { %900 = vmatprep.mubr.f32.mxu1 %v432_v4 }
 0x28d   :  { %901 = vmatmul.mubr.f32.gmra.mxu1 %v433_v5 }
 0x341   :  { %v893_v7 = vpop.f32.mrf.mxu1 }
 0x342   :  { %v531_v8 = vadd.f32 %v893_v7, %v630_v6 }
 0x343   :  { %v525_v9 = vpop.f32.mrf.mxu1 }
 0x344   :  { %565 = vst [vmem:[%s1260_s3 + $0x8] sm:$0xff] %v531_v8  ;;  %v526_v10 = vadd.f32 %v630_v6, %v525_v9 }
 0x345   :  { %v896_v11 = vpop.f32.mrf.mxu1 }
 0x346   :  { %564 = vst [vmem:[%s1260_s3] sm:$0xff] %v526_v10  ;;  %v541_v12 = vadd.f32 %v896_v11, %v630_v6 }
 0x347   :  { %v535_v13 = vpop.f32.mrf.mxu1 }
 0x348   :  { %567 = vst [vmem:[%s1260_s3 + $0x18] sm:$0xff] %v541_v12  ;;  %v536_v14 = vadd.f32 %v630_v6, %v535_v13 }
 0x349   :  { %v899_v15 = vpop.f32.mrf.mxu1 }
 0x34a   :  { %566 = vst [vmem:[%s1260_s3 + $0x10] sm:$0xff] %v536_v14  ;;  %v551_v16 = vadd.f32 %v899_v15, %v630_v6 }
 0x34b   :  { %v545_v17 = vpop.f32.mrf.mxu1 }
 0x34c   :  { %569 = vst [vmem:[%s1260_s3 + $0x28] sm:$0xff] %v551_v16  ;;  %v546_v18 = vadd.f32 %v630_v6, %v545_v17 }
 0x34d   :  { %v902_v19 = vpop.f32.mrf.mxu1 }
 0x34e   :  { %568 = vst [vmem:[%s1260_s3 + $0x20] sm:$0xff] %v546_v18  ;;  %v561_v20 = vadd.f32 %v902_v19, %v630_v6 }
 0x34f   :  { %v555_v21 = vpop.f32.mrf.mxu1 }
 0x350   :  { %571 = vst [vmem:[%s1260_s3 + $0x38] sm:$0xff] %v561_v20  ;;  %v556_v22 = vadd.f32 %v630_v6, %v555_v21 }
 0x352   :  { %570 = vst [vmem:[%s1260_s3 + $0x30] sm:$0xff] %v556_v22 }

</bundles_post_ra>
